<compile_context>
chip_gen: v7x
topology: tpu7x:2x2x1
jax: 0.10.0
libtpu: 0.0.40
codegen_flags: <defaults>
</compile_context>

<pallas_src>
import jax
import jax.numpy as jnp
import numpy as np
from jax.experimental import pallas as pl
from jax.experimental.pallas import tpu as pltpu

EPS = 1e-5
NEG_SLOPE = 0.2
LANE = 128
K_TILE_MAX = 2048          # K-block target (elements) when K is large
TM_CAP = 8192              # row-tile cap (columns); >1024-wide is already ~roofline


def _vmem_limit_bytes():
    """Generation-aware scoped-VMEM limit (~96 MiB on 128-MiB parts, ~48 MiB on v7x)."""
    cap = 0
    try:
        cap = int(getattr(pltpu.get_tpu_info(), "vmem_capacity_bytes", 0))
    except Exception:
        cap = 0
    if cap <= 0:
        cap = 64 * 1024 * 1024          # conservative fallback (v7x per-TensorCore)
    return int(min(96 << 20, cap * 3 // 4))


def _conv_y_stats_kernel(w_ref, a_ref, y_ref, sum_ref, ssq_ref, acc_ref):
    """K-tiled conv GEMM -> bf16 y tile + per-channel partial sum / sum-of-squares."""
    k = pl.program_id(1)

    @pl.when(k == 0)
    def _():
        acc_ref[...] = jnp.zeros_like(acc_ref)

    acc_ref[...] += jnp.dot(w_ref[...], a_ref[...],
                            preferred_element_type=jnp.float32)

    @pl.when(k == pl.num_programs(1) - 1)
    def _():
        y = acc_ref[...]                                     # (C_out, tm) f32
        y_ref[...] = y.astype(y_ref.dtype)
        sum_ref[...] = jnp.sum(y, axis=1, keepdims=True)[None]
        ssq_ref[...] = jnp.sum(y * y, axis=1, keepdims=True)[None]


def _bn_lrelu_kernel(y_ref, scale_ref, shift_ref, o_ref):
    """Pure-VPU folded BN affine + LeakyReLU(0.2) over the cached bf16 y tile."""
    z = y_ref[...].astype(jnp.float32) * scale_ref[...] + shift_ref[...]
    o_ref[...] = jnp.where(z >= 0, z, NEG_SLOPE * z).reshape(o_ref.shape)


def _k1_tiling(M, K, C_out, budget):
    """Pick (tm, num_tiles, tk, num_k) from a W-aware VMEM budget."""
    # K tile: full K when it fits, else a lane-aligned divisor near K_TILE_MAX.
    tk = K
    if K > K_TILE_MAX:
        d = (K_TILE_MAX // LANE) * LANE
        while d >= LANE:
            if K % d == 0:
                tk = d
                break
            d -= LANE
    num_k = K // tk
    # Per output column: double-buffered bf16 A tile + double-buffered bf16 y
    # tile + f32 accumulator.  Fixed: double-buffered bf16 W block + slack.
    per_col = 4 * tk + 8 * C_out
    fixed = 4 * C_out * tk + (1 << 20)
    avail = max(budget - fixed, per_col * LANE)
    fit_blocks = max(1, min(TM_CAP // LANE, (avail // per_col) // LANE))
    m_blocks = -(-M // LANE)
    num_tiles = -(-m_blocks // fit_blocks)
    tm = (-(-m_blocks // num_tiles)) * LANE
    return int(tm), int(num_tiles), int(tk), int(num_k)


def _k2_tile(HoWo, C_out, budget):
    """Largest lane-aligned divisor of Ho*Wo that fits kernel-2's VMEM budget."""
    per_col = 12 * C_out                 # y bf16 dbl-buf + f32 out dbl-buf
    cap = max(LANE, budget // per_col)
    d = (min(cap, HoWo) // LANE) * LANE
    while d >= LANE:
        if HoWo % d == 0:
            return int(d)
        d -= LANE
    return None


def down_forward(x, conv_w, gamma, beta):
    """x: (N, C_in, H, W) f32; conv_w: (C_out, C_in, 4, 4); gamma/beta: (C_out,)."""
    N, C_in, H, W = x.shape
    C_out = conv_w.shape[0]
    Ho, Wo = H // 2, W // 2
    HoWo = Ho * Wo
    K = C_in * 16
    M = N * HoWo

    vmem_limit = _vmem_limit_bytes()
    budget = max(vmem_limit - (8 << 20), 8 << 20)     # headroom for Mosaic scratch
    tm, num_tiles, tk, num_k = _k1_tiling(M, K, C_out, budget)
    M_pad = num_tiles * tm

    # ---- glue: bf16 im2col in TRANSPOSED (K, M) layout, M on the lane axis.
    # x is transposed once (1x-sized); taps are stacked (kh, kw, C_in)-major so
    # the 4x-sized patch tensor needs no transpose; the tiny weight is
    # transposed instead.
    # TODO(synk): fold the 16-tap patch extraction into kernel 1 (pl.ANY x_pad
    # + strided in-kernel slices) so A_t never exists in HBM at all.
    x_b = jnp.transpose(x.astype(jnp.bfloat16), (1, 0, 2, 3))      # (C_in, N, H, W)
    x_pad = jnp.pad(x_b, ((0, 0), (0, 0), (1, 1), (1, 1)))
    taps = [x_pad[:, :, kh:kh + 2 * Ho:2, kw:kw + 2 * Wo:2]
            for kh in range(4) for kw in range(4)]                  # 16 x (C_in,N,Ho,Wo)
    A_t = jnp.stack(taps, axis=0).reshape(K, M)                     # K = (kh, kw, C_in)
    if M_pad != M:
        A_t = jnp.pad(A_t, ((0, 0), (0, M_pad - M)))                # zero cols: no bias
    W_t = conv_w.transpose(0, 2, 3, 1).reshape(C_out, K).astype(jnp.bfloat16)

    # ---- kernel 1: conv GEMM -> y (bf16) + per-tile partial BN statistics ----
    y_t, part_sum, part_ssq = pl.pallas_call(
        _conv_y_stats_kernel,
        out_shape=(jax.ShapeDtypeStruct((C_out, M_pad), jnp.bfloat16),
                   jax.ShapeDtypeStruct((num_tiles, C_out, 1), jnp.float32),
                   jax.ShapeDtypeStruct((num_tiles, C_out, 1), jnp.float32)),
        grid_spec=pltpu.PrefetchScalarGridSpec(
            num_scalar_prefetch=0,
            grid=(num_tiles, num_k),
            in_specs=[
                pl.BlockSpec((C_out, tk), lambda i, k: (0, k)),
                pl.BlockSpec((tk, tm), lambda i, k: (k, i)),
            ],
            out_specs=[
                pl.BlockSpec((C_out, tm), lambda i, k: (0, i)),
                pl.BlockSpec((1, C_out, 1), lambda i, k: (i, 0, 0)),
                pl.BlockSpec((1, C_out, 1), lambda i, k: (i, 0, 0)),
            ],
            scratch_shapes=[pltpu.VMEM((C_out, tm), jnp.float32)]),
        compiler_params=pltpu.CompilerParams(
            dimension_semantics=("parallel", "arbitrary"),
            vmem_limit_bytes=vmem_limit),
    )(W_t, A_t)

    # ---- tiny glue: finalize BN stats (biased batch variance), fold affine ----
    s = jnp.sum(part_sum[:, :, 0], axis=0)                 # (C_out,)
    ssq = jnp.sum(part_ssq[:, :, 0], axis=0)
    mean = s / M
    var = jnp.maximum(ssq / M - mean * mean, 0.0)           # clamp cancellation
    inv_std = 1.0 / jnp.sqrt(var + EPS)
    scale = (gamma * inv_std).reshape(C_out, 1).astype(jnp.float32)
    shift = (beta - mean * gamma * inv_std).reshape(C_out, 1).astype(jnp.float32)

    # ---- kernel 2: pure-VPU BN affine + LeakyReLU over the cached bf16 y ----
    tm2 = _k2_tile(HoWo, C_out, budget) if HoWo % LANE == 0 else None

    if tm2 is not None:
        # Lane-aligned Ho*Wo: write the output directly in NCHW layout.
        T2 = HoWo // tm2
        out3 = pl.pallas_call(
            _bn_lrelu_kernel,
            out_shape=jax.ShapeDtypeStruct((N, C_out, HoWo), jnp.float32),
            grid_spec=pltpu.PrefetchScalarGridSpec(
                num_scalar_prefetch=0,
                grid=(N, T2),
                in_specs=[
                    pl.BlockSpec((C_out, tm2), lambda n, t: (0, n * T2 + t)),
                    pl.BlockSpec((C_out, 1), lambda n, t: (0, 0)),
                    pl.BlockSpec((C_out, 1), lambda n, t: (0, 0)),
                ],
                out_specs=pl.BlockSpec((1, C_out, tm2), lambda n, t: (n, 0, t)),
            ),
            compiler_params=pltpu.CompilerParams(
                dimension_semantics=("parallel", "parallel"),
                vmem_limit_bytes=vmem_limit),
        )(y_t, scale, shift)
        return out3.reshape(N, C_out, Ho, Wo)

    # Fallback for lane-unaligned Ho*Wo (tiny images): (C_out, M) layout + XLA transpose.
    out_t = pl.pallas_call(
        _bn_lrelu_kernel,
        out_shape=jax.ShapeDtypeStruct((C_out, M_pad), jnp.float32),
        grid_spec=pltpu.PrefetchScalarGridSpec(
            num_scalar_prefetch=0,
            grid=(num_tiles,),
            in_specs=[
                pl.BlockSpec((C_out, tm), lambda i: (0, i)),
                pl.BlockSpec((C_out, 1), lambda i: (0, 0)),
                pl.BlockSpec((C_out, 1), lambda i: (0, 0)),
            ],
            out_specs=pl.BlockSpec((C_out, tm), lambda i: (0, i)),
        ),
        compiler_params=pltpu.CompilerParams(
            dimension_semantics=("parallel",),
            vmem_limit_bytes=vmem_limit),
    )(y_t, scale, shift)
    return out_t[:, :M].reshape(C_out, N, Ho, Wo).transpose(1, 0, 2, 3)


def reference(x, conv_w, gamma, beta):
    """Pure-JAX reference matching PyTorch `down` (training-mode BatchNorm)."""
    y = jax.lax.conv_general_dilated(
        x, conv_w, window_strides=(2, 2), padding=((1, 1), (1, 1)),
        dimension_numbers=("NCHW", "OIHW", "NCHW"))
    mean = y.mean(axis=(0, 2, 3), keepdims=True)
    var = y.var(axis=(0, 2, 3), keepdims=True)              # biased, like BN training
    yn = (y - mean) / jnp.sqrt(var + EPS)
    yn = yn * gamma.reshape(1, -1, 1, 1) + beta.reshape(1, -1, 1, 1)
    return jnp.where(yn >= 0, yn, NEG_SLOPE * yn)


if __name__ == "__main__":
    key = jax.random.PRNGKey(0)

    def run_case(N, C_in, C_out, H, W, k):
        k1, k2, k3, k4 = jax.random.split(k, 4)
        x = jax.random.normal(k1, (N, C_in, H, W), jnp.float32)
        conv_w = 0.1 * jax.random.normal(k2, (C_out, C_in, 4, 4), jnp.float32)
        gamma = 1.0 + 0.1 * jax.random.normal(k3, (C_out,), jnp.float32)
        beta = 0.1 * jax.random.normal(k4, (C_out,), jnp.float32)
        out = jax.block_until_ready(down_forward(x, conv_w, gamma, beta))
        assert out.shape == (N, C_out, H // 2, W // 2)
        ref = jax.block_until_ready(reference(x, conv_w, gamma, beta))
        np.testing.assert_allclose(np.asarray(out), np.asarray(ref),
                                   atol=3e-2, rtol=3e-2)

    ka, kb = jax.random.split(key)
    run_case(2, 4, 8, 16, 16, ka)    # lane-unaligned Ho*Wo -> fallback layout path
    run_case(2, 4, 8, 32, 32, kb)    # lane-aligned Ho*Wo -> direct NCHW output path
    print("KERNEL_OK")
</pallas_src>

<mosaic_0001>
module attributes {stable_mosaic.version = 11 : i64} {
  func.func @_conv_y_stats_kernel(%arg0: i32, %arg1: i32, %arg2: memref<8x64xbf16, #tpu.memory_space<vmem>>, %arg3: memref<64x128xbf16, #tpu.memory_space<vmem>>, %arg4: memref<8x128xbf16, #tpu.memory_space<vmem>>, %arg5: memref<1x8x1xf32, #tpu.memory_space<vmem>>, %arg6: memref<1x8x1xf32, #tpu.memory_space<vmem>>, %arg7: memref<8x128xf32, #tpu.memory_space<vmem>>) attributes {dimension_semantics = [#tpu.dimension_semantics<parallel>, #tpu.dimension_semantics<arbitrary>], iteration_bounds = array<i64: 1, 1>, scalar_prefetch = 0 : i64, scratch_operands = 1 : i64, tpu.core_type = #tpu.core_type<tc>, window_params = [{transform_indices = @transform_0, window_bounds = array<i64: 8, 64>}, {transform_indices = @transform_1, window_bounds = array<i64: 64, 128>}, {transform_indices = @transform_2, window_bounds = array<i64: 8, 128>}, {transform_indices = @transform_3, window_bounds = array<i64: 1, 8, 1>}, {transform_indices = @transform_4, window_bounds = array<i64: 1, 8, 1>}]} {
    %c0_i32 = arith.constant 0 : i32
    %0 = arith.cmpi eq, %arg1, %c0_i32 : i32
    %1 = arith.extui %0 : i1 to i32
    %c0_i32_0 = arith.constant 0 : i32
    %2 = arith.cmpi ne, %1, %c0_i32_0 : i32
    scf.if %2 {
      %cst_10 = arith.constant 0.000000e+00 : f32
      %12 = vector.broadcast %cst_10 : f32 to vector<8x128xf32>
      %c0_11 = arith.constant 0 : index
      %c0_12 = arith.constant 0 : index
      %13 = vector.load %arg7[%c0_11, %c0_12] : memref<8x128xf32, #tpu.memory_space<vmem>>, vector<8x128xf32>
      tpu.vector_store %arg7[%c0_11, %c0_12], %12 {strides = array<i32>} : memref<8x128xf32, #tpu.memory_space<vmem>>, vector<8x128xf32>,
    } else {
    }
    %c0 = arith.constant 0 : index
    %c0_1 = arith.constant 0 : index
    %3 = vector.load %arg7[%c0, %c0_1] : memref<8x128xf32, #tpu.memory_space<vmem>>, vector<8x128xf32>
    %c0_2 = arith.constant 0 : index
    %c0_3 = arith.constant 0 : index
    %4 = vector.load %arg2[%c0_2, %c0_3] : memref<8x64xbf16, #tpu.memory_space<vmem>>, vector<8x64xbf16>
    %c0_4 = arith.constant 0 : index
    %c0_5 = arith.constant 0 : index
    %5 = vector.load %arg3[%c0_4, %c0_5] : memref<64x128xbf16, #tpu.memory_space<vmem>>, vector<64x128xbf16>
    %cst = arith.constant dense<0.000000e+00> : vector<8x128xf32>
    %6 = tpu.matmul %4, %5, %cst {dimension_numbers = #tpu.dot_dimension_numbers<[1], [0], [0], [1], [0, 0, 1, 1], [], []>} : vector<8x64xbf16>, vector<64x128xbf16>, vector<8x128xf32> -> vector<8x128xf32>
    %7 = arith.addf %3, %6 : vector<8x128xf32>
    %c0_6 = arith.constant 0 : index
    %c0_7 = arith.constant 0 : index
    %8 = vector.load %arg7[%c0_6, %c0_7] : memref<8x128xf32, #tpu.memory_space<vmem>>, vector<8x128xf32>
    tpu.vector_store %arg7[%c0_6, %c0_7], %7 {strides = array<i32>} : memref<8x128xf32, #tpu.memory_space<vmem>>, vector<8x128xf32>,
    %c0_i32_8 = arith.constant 0 : i32
    %9 = arith.cmpi eq, %arg1, %c0_i32_8 : i32
    %10 = arith.extui %9 : i1 to i32
    %c0_i32_9 = arith.constant 0 : i32
    %11 = arith.cmpi ne, %10, %c0_i32_9 : i32
    scf.if %11 {
      %c0_10 = arith.constant 0 : index
      %c0_11 = arith.constant 0 : index
      %12 = vector.load %arg7[%c0_10, %c0_11] : memref<8x128xf32, #tpu.memory_space<vmem>>, vector<8x128xf32>
      %13 = arith.truncf %12 : vector<8x128xf32> to vector<8x128xbf16>
      %c0_12 = arith.constant 0 : index
      %c0_13 = arith.constant 0 : index
      %14 = vector.load %arg4[%c0_12, %c0_13] : memref<8x128xbf16, #tpu.memory_space<vmem>>, vector<8x128xbf16>
      tpu.vector_store %arg4[%c0_12, %c0_13], %13 {strides = array<i32>} : memref<8x128xbf16, #tpu.memory_space<vmem>>, vector<8x128xbf16>,
      %cst_14 = arith.constant dense<0.000000e+00> : vector<8xf32>
      %15 = vector.multi_reduction <add>, %12, %cst_14 [1] : vector<8x128xf32> to vector<8xf32>
      %16 = vector.shape_cast %15 : vector<8xf32> to vector<8x1xf32>
      %17 = vector.shape_cast %16 : vector<8x1xf32> to vector<1x8x1xf32>
      %c0_15 = arith.constant 0 : index
      %c0_16 = arith.constant 0 : index
      %c0_17 = arith.constant 0 : index
      %18 = vector.load %arg5[%c0_15, %c0_16, %c0_17] : memref<1x8x1xf32, #tpu.memory_space<vmem>>, vector<1x8x1xf32>
      tpu.vector_store %arg5[%c0_15, %c0_16, %c0_17], %17 {strides = array<i32>} : memref<1x8x1xf32, #tpu.memory_space<vmem>>, vector<1x8x1xf32>,
      %19 = arith.mulf %12, %12 : vector<8x128xf32>
      %cst_18 = arith.constant dense<0.000000e+00> : vector<8xf32>
      %20 = vector.multi_reduction <add>, %19, %cst_18 [1] : vector<8x128xf32> to vector<8xf32>
      %21 = vector.shape_cast %20 : vector<8xf32> to vector<8x1xf32>
      %22 = vector.shape_cast %21 : vector<8x1xf32> to vector<1x8x1xf32>
      %c0_19 = arith.constant 0 : index
      %c0_20 = arith.constant 0 : index
      %c0_21 = arith.constant 0 : index
      %23 = vector.load %arg6[%c0_19, %c0_20, %c0_21] : memref<1x8x1xf32, #tpu.memory_space<vmem>>, vector<1x8x1xf32>
      tpu.vector_store %arg6[%c0_19, %c0_20, %c0_21], %22 {strides = array<i32>} : memref<1x8x1xf32, #tpu.memory_space<vmem>>, vector<1x8x1xf32>,
    } else {
    }
    return
  }
  func.func @transform_0(%arg0: i32, %arg1: i32) -> (i32, i32) {
    %c0_i32 = arith.constant 0 : i32
    %c0_i32_0 = arith.constant 0 : i32
    return %c0_i32, %arg1 : i32, i32
  }
  func.func @transform_1(%arg0: i32, %arg1: i32) -> (i32, i32) {
    %c0_i32 = arith.constant 0 : i32
    return %arg1, %arg0 : i32, i32
  }
  func.func @transform_2(%arg0: i32, %arg1: i32) -> (i32, i32) {
    %c0_i32 = arith.constant 0 : i32
    %c0_i32_0 = arith.constant 0 : i32
    return %c0_i32, %arg0 : i32, i32
  }
  func.func @transform_3(%arg0: i32, %arg1: i32) -> (i32, i32, i32) {
    %c0_i32 = arith.constant 0 : i32
    %c0_i32_0 = arith.constant 0 : i32
    %c0_i32_1 = arith.constant 0 : i32
    return %arg0, %c0_i32, %c0_i32_0 : i32, i32, i32
  }
  func.func @transform_4(%arg0: i32, %arg1: i32) -> (i32, i32, i32) {
    %c0_i32 = arith.constant 0 : i32
    %c0_i32_0 = arith.constant 0 : i32
    %c0_i32_1 = arith.constant 0 : i32
    return %arg0, %c0_i32, %c0_i32_0 : i32, i32, i32
  }
}

</mosaic_0001>

<bundles_post_ra>
// kernel: tpu_custom_call.1
= control target key start
LH: loop header
LB: loop body
LE: loop exit
PB: predicated region body
PF: predicated region fallthrough
CT: control target
= control target key end

     0   :  { %10 = vsyncpa [#allocation4], 0  ;;  %s351_s0 = inlined_call_operand.hbm [shape: bf16[8,64], index: 0, kind: input, shape index: {}]   ;;  %s352_s1 = inlined_call_operand.hbm [shape: bf16[64,128], index: 1, kind: input, shape index: {}]   ;;  %s353_s2 = inlined_call_operand.hbm [shape: bf16[8,128], index: 2, kind: output, shape index: {0}]   ;;  %s354_s3 = inlined_call_operand.vmem [shape: f32[1,8,1], index: 3, kind: output, shape index: {1}]   ;;  %s355_s4 = inlined_call_operand.vmem [shape: f32[1,8,1], index: 4, kind: output, shape index: {2}]  }
   0x1   :  { %11 = vsyncpa [#allocation7], 0 }
   0x2   :  { %12 = vsyncpa [#allocation5], 0  ;;  %s270_s15 = smov [#allocation3]   ;;  %s271_s17 = smov [#allocation6]  }
   0x3   :  { %s19_s16 = sshll.u32 %s270_s15, 4  ;;  %s28_s18 = sshll.u32 %s271_s17, 4  ;;  %s20_s16 = int_to_ptr.vmem [resolvable:$true] %s19_s16  ;;  %s302_s18 = int_to_ptr.vmem [resolvable:$true] %s28_s18 }
   0x4   :  { %s198_s21 = scalar_lea.hbm %s351_s0, 64 }
   0x5   :  { %p199_p0 = scmp.ne.s32.totalorder %s351_s0, %s198_s21  ;;  %p202_p1 = scmp.lt.u32.totalorder %s198_s21, %s351_s0 }
   0x7   :  { %p204_p2 = pnand %p202_p1, %p199_p0 }
   0x9   :  { %207 = shalt.err (!%p204_p2)
}
   0xa   :  { %s208_s26 = scalar_lea.vmem %s20_s16, 64  ;;  %p213_p4 = scmp.lt.s32.totalorder %s20_s16, %s20_s16 }
   0xb   :  { %p209_p3 = scmp.ne.s32.totalorder %s20_s16, %s208_s26  ;;  %p214_p5 = scmp.lt.s32.totalorder %s208_s26, %s208_s26 }
   0xd   :  { %p215_p6 = por %p214_p5, %p213_p4 }
   0xf   :  { %p216_p7 = pnand %p215_p6, %p209_p3 }
  0x11   :  { %219 = shalt.err (!%p216_p7)
}
  0x12   :  { %22 = dma.hbm_to_vmem [thread:$0]  %s351_s0, 64, %s20_s16, [#allocation4]  }
  0x13   :  { %s220_s5 = scalar_lea.hbm %s352_s1, 512 }
  0x14   :  { %p221_p8 = scmp.ne.s32.totalorder %s352_s1, %s220_s5  ;;  %p224_p9 = scmp.lt.u32.totalorder %s220_s5, %s352_s1 }
  0x16   :  { %p226_p10 = pnand %p224_p9, %p221_p8 }
  0x18   :  { %229 = shalt.err (!%p226_p10)
}
  0x19   :  { %s230_s10 = scalar_lea.vmem %s302_s18, 512  ;;  %p235_p12 = scmp.lt.s32.totalorder %s302_s18, %s302_s18 }
  0x1a   :  { %p231_p11 = scmp.ne.s32.totalorder %s302_s18, %s230_s10  ;;  %p236_p13 = scmp.lt.s32.totalorder %s230_s10, %s230_s10 }
  0x1c   :  { %p237_p0 = por %p236_p13, %p235_p12 }
  0x1e   :  { %p238_p1 = pnand %p237_p0, %p231_p11 }
  0x20   :  { %241 = shalt.err (!%p238_p1)
}
  0x21   :  { %s272_s0 = smov 64   ;;  %s273_s11 = smov 4  }
  0x22   :  { %34 = dma.hbm_to_vmem [thread:$0]  %s352_s1, 512, %s302_s18, [#allocation7], %s272_s0, %s272_s0, %s273_s11  }
  0x23   :  { %264 = dma.done.wait [#allocation4], 64  }
  0x24   :  { %265 = vsyncadd [#allocation4], 4294967232 }
  0x25   :  { %266 = dma.done.wait [#allocation7], 512  }
  0x26   :  { %267 = vsyncadd [#allocation7], 4294966784  ;;  %v274_v0 = vmov 0.0   ;;  %vm275_vm0 = vmmov 0   ;;  %v194_v1 = vld [vmem:[#allocation6] sm:$0xff]   ;;  %v195_v2 = vld [vmem:[#allocation6 + $0x8] sm:$0xff]  }
  0x27   :  { %175 = vmatprep.subr.bf16.mxu0 %v274_v0  ;;  %183 = vmatprep.mubr.msk.bf16.mxu0 %vm275_vm0, %v274_v0  ;;  %v196_v3 = vld [vmem:[#allocation6 + $0x10] sm:$0xff]   ;;  %v197_v4 = vld [vmem:[#allocation6 + $0x18] sm:$0xff]   ;;  %vm81_vm1 = vcmask 523264   ;;  %s276_s1 = smov [#allocation8]  }
  0x28   :  { %176 = vmatpush3.bf16.msra.mxu0 %v194_v1  ;;  %v48_v5 = vld [vmem:[#allocation3] sm:$0xf]  ;;  %s147_s14 = sshll.u32 %s276_s1, 4  ;;  %s148_s14 = int_to_ptr.vmem [resolvable:$true] %s147_s14 }
  0x29   :  { %177 = vmatprep.subr.bf16.mxu0 %v274_v0  ;;  %s242_s15 = scalar_lea.vmem %s148_s14, 64  ;;  %p247_p3 = scmp.lt.s32.totalorder %s148_s14, %s148_s14 }
  0x2a   :  { %p243_p2 = scmp.ne.s32.totalorder %s148_s14, %s242_s15  ;;  %p248_p4 = scmp.lt.s32.totalorder %s242_s15, %s242_s15 }
  0x2c   :  { %178 = vmatpush3.bf16.msra.mxu0 %v195_v2  ;;  %p249_p5 = por %p248_p4, %p247_p3 }
  0x2d   :  { %179 = vmatprep.subr.bf16.mxu0 %v274_v0 }
  0x2e   :  { %p250_p6 = pnand %p249_p5, %p243_p2 }
  0x30   :  { %180 = vmatpush3.bf16.msra.mxu0 %v196_v3 }
  0x31   :  { %181 = vmatprep.subr.bf16.mxu0 %v274_v0 }
  0x34   :  { %182 = vmatpush3.bf16.msra.mxu0 %v197_v4 }
  0x37   :  { %184 = vmatmul.mubr.msk.bf16.vlgmr.msra.gmra.mrb[0].mxu0 %vm81_vm1, %v48_v5 }
 0x10a   :  { %v119_v6 = vpop.f32.mrb[0].mxu0 }
 0x10b   :  { %v131_v7 = vpack.c.bf16 %v119_v6, %v119_v6  ;;  %133 = vadd.xlane.f32.xlu0 %v119_v6  ;;  %v185_v8 = vpop.f32.mrb[1].mxu0  ;;  %v137_v11 = vmul.f32 %v119_v6, %v119_v6 }
 0x10c   :  { %v122_v9 = vpop.f32.mrb[2].mxu0 }
 0x10d   :  { %132 = vst [vmem:[#allocation8] sm:$0xf] %v131_v7  ;;  %v186_v10 = vpop.f32.mrb[3].mxu0 }
 0x10f   :  { %138 = vadd.xlane.f32.xlu0 %v137_v11 }
 0x110   :  { %253 = shalt.err (!%p250_p6)
}
 0x111   :  { %s254_s18 = scalar_lea.hbm %s353_s2, 64 }
 0x112   :  { %p255_p7 = scmp.ne.s32.totalorder %s353_s2, %s254_s18  ;;  %p258_p8 = scmp.lt.u32.totalorder %s254_s18, %s353_s2 }
 0x114   :  { %p260_p9 = pnand %p258_p8, %p255_p7 }
 0x116   :  { %263 = shalt.err (!%p260_p9)
}
 0x117   :  { %150 = dma.vmem_to_hbm [thread:$0]  %s148_s14, 64, %s353_s2, [#allocation5]   ;;  %vm135_vm2 = vcmask 7168  }
 0x198   :  { %v134_v12 = vpop.xlane.xlu0 %133 }
 0x199   :  { %136 = vst.msk [vmem:[%s354_s3] sm:$0xff] %vm135_vm2, %v134_v12 }
 0x19c   :  { %v139_v13 = vpop.xlane.xlu0 %138 }
 0x19d   :  { %140 = vst.msk [vmem:[%s355_s4] sm:$0xff] %vm135_vm2, %v139_v13 }
 0x19e   :  { %268 = dma.done.wait [#allocation5], 64  }
 0x19f   :  { %269 = vsyncadd [#allocation5], 4294967232 }
 0x1a0   :  { %162 = vsyncpa [#allocation4], 1 }
 0x1a1   :  { %163 = vsyncpa [#allocation7], 1 }
 0x1a2   :  { %164 = vsyncpa [#allocation5], 1 }

</bundles_post_ra>
